<compile_context>
chip_gen: v7x
topology: tpu7x:2x2x1
jax: 0.10.0
libtpu: 0.0.40
codegen_flags: <defaults>
</compile_context>

<pallas_src>
import jax
import jax.numpy as jnp
from jax.experimental import pallas as pl
from jax.experimental.pallas import tpu as pltpu

IN_DIM = 4
HID_DIM = 8
OUT_DIM = 2

LANES = 128
PACK_GRANULE = 4 * LANES      # 512: per-tile batch granule (needed for the 2x/4x packing)
TB_MAX = 65536                # logical batch elements per grid step (multiple of 512)
TINY_MAX = 4096               # below this, use the gridless unpacked VPU path
MIN_TILE_FOR_SPLIT = 8192     # only force a >=4-step grid if each step stays >= this


def _round_up(x, m):
    return ((x + m - 1) // m) * m


def _cdiv(a, b):
    return (a + b - 1) // b


def _mlp_fp32(x, w1, b1, w2, b2):
    """x: (IN_DIM, n) -> (OUT_DIM, n).

    Exact-f32 VPU formulation: 4 + 8 broadcast multiply-accumulate terms per column
    (w columns broadcast across lanes, x/h rows broadcast across sublanes).  Keeps the
    MXU (and its fill/drain latency / padding waste at K=4/8) out of the path; the
    VALU slots are idle under the DMA bound anyway.
    """
    n = x.shape[1]
    h = jnp.broadcast_to(b1, (HID_DIM, n))
    for k in range(IN_DIM):
        h = h + w1[:, k:k + 1] * x[k:k + 1, :]
    h = jnp.maximum(h, 0.0)
    y = jnp.broadcast_to(b2, (OUT_DIM, n))
    for k in range(HID_DIM):
        y = y + w2[:, k:k + 1] * h[k:k + 1, :]
    return y


def smallnet_tiny_kernel(x_ref, w1_ref, b1_ref, w2_ref, b2_ref, o_ref):
    # Gridless small-batch path: x is (IN, Bp), output (OUT, Bp).
    o_ref[...] = _mlp_fp32(x_ref[...], w1_ref[...], b1_ref[...],
                           w2_ref[...], b2_ref[...])


def smallnet_packed_kernel(x_ref, w1_ref, b1_ref, w2_ref, b2_ref, o_ref):
    # x_ref: (8, tb/2)  rows 0-3 = features of the tile's first batch half,
    #                   rows 4-7 = features of the tile's second batch half.
    # o_ref: (8, tb/4)  rows (2q, 2q+1) = the 2 outputs of the tile's q-th batch quarter.
    q = o_ref.shape[1]                                   # tb // 4
    w1 = w1_ref[...]
    b1 = b1_ref[...]
    w2 = w2_ref[...]
    b2 = b2_ref[...]
    y_lo = _mlp_fp32(x_ref[0:IN_DIM, :], w1, b1, w2, b2)           # (2, tb/2)
    y_hi = _mlp_fp32(x_ref[IN_DIM:2 * IN_DIM, :], w1, b1, w2, b2)  # (2, tb/2)
    # Re-pack into the sublane-dense (8, tb/4) output tile (dense DMA writeback).
    o_ref[0:2, :] = y_lo[:, :q]
    o_ref[2:4, :] = y_lo[:, q:]
    o_ref[4:6, :] = y_hi[:, :q]
    o_ref[6:8, :] = y_hi[:, q:]


def smallnet_forward(x, w1, b1, w2, b2, *, tb_max=TB_MAX):
    """x: (B, 4) f32.  w1: (8, 4), b1: (8,), w2: (2, 8), b2: (2,)  (PyTorch layout)."""
    B = x.shape[0]
    b1c = b1.reshape(HID_DIM, 1)
    b2c = b2.reshape(OUT_DIM, 1)

    # ---------- tiny-batch path: single tile, no grid, pure VPU ----------
    if B <= TINY_MAX:
        bp = _round_up(B, LANES)
        xt = jnp.pad(x, ((0, bp - B), (0, 0))).T                    # (IN, bp)
        yt = pl.pallas_call(
            smallnet_tiny_kernel,
            out_shape=jax.ShapeDtypeStruct((OUT_DIM, bp), jnp.float32),
            in_specs=[pl.BlockSpec(memory_space=pltpu.MemorySpace.VMEM)] * 5,
            out_specs=pl.BlockSpec(memory_space=pltpu.MemorySpace.VMEM),
        )(xt, w1, b1c, w2, b2c)
        return yt.T[:B]

    # ---------- streamed, sublane-packed path ----------
    tb_max = max(_round_up(tb_max, PACK_GRANULE), PACK_GRANULE)

    # Grid sizing: big tiles (per-step overhead amortized), even and >=4 steps for the
    # v7x 2-TensorCore split when B is large enough, bounded padding otherwise.
    n_steps = _cdiv(B, tb_max)
    if B >= 4 * MIN_TILE_FOR_SPLIT:
        n_steps = max(n_steps, 4)
    if n_steps > 1 and n_steps % 2 == 1:
        n_steps += 1
    tb = _round_up(_cdiv(B, n_steps), PACK_GRANULE)      # per-tile logical batch
    bp = n_steps * tb                                    # waste <= 512 lanes per step
    half = tb // 2
    quarter = tb // 4

    # Pack batch into sublanes (single relayout pass over x):
    #   xp[s*4 + f, i*half + c] = x[i*tb + s*half + c, f]
    xp = jnp.pad(x, ((0, bp - B), (0, 0)))
    xp = xp.reshape(n_steps, 2, half, IN_DIM).transpose(1, 3, 0, 2)
    xp = xp.reshape(2 * IN_DIM, bp // 2)                 # (8, bp/2), sublane-dense

    yp = pl.pallas_call(
        smallnet_packed_kernel,
        out_shape=jax.ShapeDtypeStruct((4 * OUT_DIM, bp // 4), jnp.float32),
        grid=(n_steps,),
        in_specs=[
            pl.BlockSpec((2 * IN_DIM, half), lambda i: (0, i)),       # x tile streams
            pl.BlockSpec((HID_DIM, IN_DIM), lambda i: (0, 0)),        # W1 resident
            pl.BlockSpec((HID_DIM, 1), lambda i: (0, 0)),             # b1 resident
            pl.BlockSpec((OUT_DIM, HID_DIM), lambda i: (0, 0)),       # W2 resident
            pl.BlockSpec((OUT_DIM, 1), lambda i: (0, 0)),             # b2 resident
        ],
        out_specs=pl.BlockSpec((4 * OUT_DIM, quarter), lambda i: (0, i)),
        compiler_params=pltpu.CompilerParams(
            dimension_semantics=("parallel",),           # megacore-shardable batch axis
            vmem_limit_bytes=32 * 1024 * 1024,           # covers v5e's 16 MiB default
        ),
    )(xp, w1, b1c, w2, b2c)

    # Unpack (8, bp/4) -> (bp, 2) -> (B, 2): cheap relayout on the small output.
    y = yp.reshape(4, OUT_DIM, n_steps, quarter).transpose(2, 0, 3, 1)
    return y.reshape(bp, OUT_DIM)[:B]


def init_params(key):
    # nn.Linear-style init, kept in native PyTorch (out_features, in_features) layout.
    k1, k2, k3, k4 = jax.random.split(key, 4)
    bound1 = 1.0 / (IN_DIM ** 0.5)
    bound2 = 1.0 / (HID_DIM ** 0.5)
    w1 = jax.random.uniform(k1, (HID_DIM, IN_DIM), jnp.float32, -bound1, bound1)
    b1 = jax.random.uniform(k2, (HID_DIM,), jnp.float32, -bound1, bound1)
    w2 = jax.random.uniform(k3, (OUT_DIM, HID_DIM), jnp.float32, -bound2, bound2)
    b2 = jax.random.uniform(k4, (OUT_DIM,), jnp.float32, -bound2, bound2)
    return w1, b1, w2, b2


def reference(x, w1, b1, w2, b2):
    # Explicit f32 precision so the reference matches the kernel's exact-f32 VPU math.
    h = jnp.maximum(
        jnp.dot(x, w1.T, precision=jax.lax.Precision.HIGHEST) + b1, 0.0)
    return jnp.dot(h, w2.T, precision=jax.lax.Precision.HIGHEST) + b2


if __name__ == "__main__":
    key = jax.random.PRNGKey(0)
    k_x1, k_x2, k_p = jax.random.split(key, 3)
    w1, b1, w2, b2 = init_params(k_p)

    # 1) Small batch (typical module use): gridless single-tile VPU path.
    B_small = 8
    x_small = jax.random.normal(k_x1, (B_small, IN_DIM), jnp.float32)
    out_small = jax.block_until_ready(smallnet_forward(x_small, w1, b1, w2, b2))
    ref_small = reference(x_small, w1, b1, w2, b2)
    assert out_small.shape == (B_small, OUT_DIM)
    assert jnp.allclose(out_small, ref_small, atol=1e-4, rtol=1e-4)

    # 2) Non-multiple batch through the streamed sublane-packed path (default tile,
    #    single grid step): exercises the packing/unpacking layout at production tiles.
    B_mid = 5000
    x_mid = jax.random.normal(k_x2, (B_mid, IN_DIM), jnp.float32)
    out_mid = jax.block_until_ready(smallnet_forward(x_mid, w1, b1, w2, b2))
    ref_mid = reference(x_mid, w1, b1, w2, b2)
    assert out_mid.shape == (B_mid, OUT_DIM)
    assert jnp.allclose(out_mid, ref_mid, atol=1e-4, rtol=1e-4)

    # 3) Same batch, forced small tile -> multi-step even grid: exercises the index
    #    maps, bounded padding, and the parallel batch axis.
    out_grid = jax.block_until_ready(
        smallnet_forward(x_mid, w1, b1, w2, b2, tb_max=1024))
    assert out_grid.shape == (B_mid, OUT_DIM)
    assert jnp.allclose(out_grid, ref_mid, atol=1e-4, rtol=1e-4)

    print("KERNEL_OK")
</pallas_src>

<mosaic_0001>
module attributes {stable_mosaic.version = 11 : i64} {
  func.func @smallnet_tiny_kernel(%arg0: memref<4x128xf32, #tpu.memory_space<vmem>>, %arg1: memref<8x4xf32, #tpu.memory_space<vmem>>, %arg2: memref<8x1xf32, #tpu.memory_space<vmem>>, %arg3: memref<2x8xf32, #tpu.memory_space<vmem>>, %arg4: memref<2x1xf32, #tpu.memory_space<vmem>>, %arg5: memref<2x128xf32, #tpu.memory_space<vmem>>) attributes {dimension_semantics = [], scalar_prefetch = 0 : i64, scratch_operands = 0 : i64, tpu.core_type = #tpu.core_type<tc>} {
    %c0 = arith.constant 0 : index
    %c0_0 = arith.constant 0 : index
    %0 = vector.load %arg0[%c0, %c0_0] : memref<4x128xf32, #tpu.memory_space<vmem>>, vector<4x128xf32>
    %c0_1 = arith.constant 0 : index
    %c0_2 = arith.constant 0 : index
    %1 = vector.load %arg1[%c0_1, %c0_2] : memref<8x4xf32, #tpu.memory_space<vmem>>, vector<8x4xf32>
    %c0_3 = arith.constant 0 : index
    %c0_4 = arith.constant 0 : index
    %2 = vector.load %arg2[%c0_3, %c0_4] : memref<8x1xf32, #tpu.memory_space<vmem>>, vector<8x1xf32>
    %c0_5 = arith.constant 0 : index
    %c0_6 = arith.constant 0 : index
    %3 = vector.load %arg3[%c0_5, %c0_6] : memref<2x8xf32, #tpu.memory_space<vmem>>, vector<2x8xf32>
    %c0_7 = arith.constant 0 : index
    %c0_8 = arith.constant 0 : index
    %4 = vector.load %arg4[%c0_7, %c0_8] : memref<2x1xf32, #tpu.memory_space<vmem>>, vector<2x1xf32>
    %5 = vector.shape_cast %2 : vector<8x1xf32> to vector<8x1xf32>
    %6 = vector.broadcast %5 : vector<8x1xf32> to vector<8x128xf32>
    %7 = vector.extract_strided_slice %1 {offsets = [0, 0], sizes = [8, 1], strides = [1, 1]} : vector<8x4xf32> to vector<8x1xf32>
    %8 = vector.extract_strided_slice %0 {offsets = [0, 0], sizes = [1, 128], strides = [1, 1]} : vector<4x128xf32> to vector<1x128xf32>
    %9 = vector.broadcast %7 : vector<8x1xf32> to vector<8x128xf32>
    %10 = vector.broadcast %8 : vector<1x128xf32> to vector<8x128xf32>
    %11 = arith.mulf %9, %10 : vector<8x128xf32>
    %12 = arith.addf %6, %11 : vector<8x128xf32>
    %13 = vector.extract_strided_slice %1 {offsets = [0, 1], sizes = [8, 1], strides = [1, 1]} : vector<8x4xf32> to vector<8x1xf32>
    %14 = vector.extract_strided_slice %0 {offsets = [1, 0], sizes = [1, 128], strides = [1, 1]} : vector<4x128xf32> to vector<1x128xf32>
    %15 = vector.broadcast %13 : vector<8x1xf32> to vector<8x128xf32>
    %16 = vector.broadcast %14 : vector<1x128xf32> to vector<8x128xf32>
    %17 = arith.mulf %15, %16 : vector<8x128xf32>
    %18 = arith.addf %12, %17 : vector<8x128xf32>
    %19 = vector.extract_strided_slice %1 {offsets = [0, 2], sizes = [8, 1], strides = [1, 1]} : vector<8x4xf32> to vector<8x1xf32>
    %20 = vector.extract_strided_slice %0 {offsets = [2, 0], sizes = [1, 128], strides = [1, 1]} : vector<4x128xf32> to vector<1x128xf32>
    %21 = vector.broadcast %19 : vector<8x1xf32> to vector<8x128xf32>
    %22 = vector.broadcast %20 : vector<1x128xf32> to vector<8x128xf32>
    %23 = arith.mulf %21, %22 : vector<8x128xf32>
    %24 = arith.addf %18, %23 : vector<8x128xf32>
    %25 = vector.extract_strided_slice %1 {offsets = [0, 3], sizes = [8, 1], strides = [1, 1]} : vector<8x4xf32> to vector<8x1xf32>
    %26 = vector.extract_strided_slice %0 {offsets = [3, 0], sizes = [1, 128], strides = [1, 1]} : vector<4x128xf32> to vector<1x128xf32>
    %27 = vector.broadcast %25 : vector<8x1xf32> to vector<8x128xf32>
    %28 = vector.broadcast %26 : vector<1x128xf32> to vector<8x128xf32>
    %29 = arith.mulf %27, %28 : vector<8x128xf32>
    %30 = arith.addf %24, %29 : vector<8x128xf32>
    %cst = arith.constant 0.000000e+00 : f32
    %31 = vector.broadcast %cst : f32 to vector<8x128xf32>
    %32 = arith.maximumf %30, %31 : vector<8x128xf32>
    %33 = vector.shape_cast %4 : vector<2x1xf32> to vector<2x1xf32>
    %34 = vector.broadcast %33 : vector<2x1xf32> to vector<2x128xf32>
    %35 = vector.extract_strided_slice %3 {offsets = [0, 0], sizes = [2, 1], strides = [1, 1]} : vector<2x8xf32> to vector<2x1xf32>
    %36 = vector.extract_strided_slice %32 {offsets = [0, 0], sizes = [1, 128], strides = [1, 1]} : vector<8x128xf32> to vector<1x128xf32>
    %37 = vector.broadcast %35 : vector<2x1xf32> to vector<2x128xf32>
    %38 = vector.broadcast %36 : vector<1x128xf32> to vector<2x128xf32>
    %39 = arith.mulf %37, %38 : vector<2x128xf32>
    %40 = arith.addf %34, %39 : vector<2x128xf32>
    %41 = vector.extract_strided_slice %3 {offsets = [0, 1], sizes = [2, 1], strides = [1, 1]} : vector<2x8xf32> to vector<2x1xf32>
    %42 = vector.extract_strided_slice %32 {offsets = [1, 0], sizes = [1, 128], strides = [1, 1]} : vector<8x128xf32> to vector<1x128xf32>
    %43 = vector.broadcast %41 : vector<2x1xf32> to vector<2x128xf32>
    %44 = vector.broadcast %42 : vector<1x128xf32> to vector<2x128xf32>
    %45 = arith.mulf %43, %44 : vector<2x128xf32>
    %46 = arith.addf %40, %45 : vector<2x128xf32>
    %47 = vector.extract_strided_slice %3 {offsets = [0, 2], sizes = [2, 1], strides = [1, 1]} : vector<2x8xf32> to vector<2x1xf32>
    %48 = vector.extract_strided_slice %32 {offsets = [2, 0], sizes = [1, 128], strides = [1, 1]} : vector<8x128xf32> to vector<1x128xf32>
    %49 = vector.broadcast %47 : vector<2x1xf32> to vector<2x128xf32>
    %50 = vector.broadcast %48 : vector<1x128xf32> to vector<2x128xf32>
    %51 = arith.mulf %49, %50 : vector<2x128xf32>
    %52 = arith.addf %46, %51 : vector<2x128xf32>
    %53 = vector.extract_strided_slice %3 {offsets = [0, 3], sizes = [2, 1], strides = [1, 1]} : vector<2x8xf32> to vector<2x1xf32>
    %54 = vector.extract_strided_slice %32 {offsets = [3, 0], sizes = [1, 128], strides = [1, 1]} : vector<8x128xf32> to vector<1x128xf32>
    %55 = vector.broadcast %53 : vector<2x1xf32> to vector<2x128xf32>
    %56 = vector.broadcast %54 : vector<1x128xf32> to vector<2x128xf32>
    %57 = arith.mulf %55, %56 : vector<2x128xf32>
    %58 = arith.addf %52, %57 : vector<2x128xf32>
    %59 = vector.extract_strided_slice %3 {offsets = [0, 4], sizes = [2, 1], strides = [1, 1]} : vector<2x8xf32> to vector<2x1xf32>
    %60 = vector.extract_strided_slice %32 {offsets = [4, 0], sizes = [1, 128], strides = [1, 1]} : vector<8x128xf32> to vector<1x128xf32>
    %61 = vector.broadcast %59 : vector<2x1xf32> to vector<2x128xf32>
    %62 = vector.broadcast %60 : vector<1x128xf32> to vector<2x128xf32>
    %63 = arith.mulf %61, %62 : vector<2x128xf32>
    %64 = arith.addf %58, %63 : vector<2x128xf32>
    %65 = vector.extract_strided_slice %3 {offsets = [0, 5], sizes = [2, 1], strides = [1, 1]} : vector<2x8xf32> to vector<2x1xf32>
    %66 = vector.extract_strided_slice %32 {offsets = [5, 0], sizes = [1, 128], strides = [1, 1]} : vector<8x128xf32> to vector<1x128xf32>
    %67 = vector.broadcast %65 : vector<2x1xf32> to vector<2x128xf32>
    %68 = vector.broadcast %66 : vector<1x128xf32> to vector<2x128xf32>
    %69 = arith.mulf %67, %68 : vector<2x128xf32>
    %70 = arith.addf %64, %69 : vector<2x128xf32>
    %71 = vector.extract_strided_slice %3 {offsets = [0, 6], sizes = [2, 1], strides = [1, 1]} : vector<2x8xf32> to vector<2x1xf32>
    %72 = vector.extract_strided_slice %32 {offsets = [6, 0], sizes = [1, 128], strides = [1, 1]} : vector<8x128xf32> to vector<1x128xf32>
    %73 = vector.broadcast %71 : vector<2x1xf32> to vector<2x128xf32>
    %74 = vector.broadcast %72 : vector<1x128xf32> to vector<2x128xf32>
    %75 = arith.mulf %73, %74 : vector<2x128xf32>
    %76 = arith.addf %70, %75 : vector<2x128xf32>
    %77 = vector.extract_strided_slice %3 {offsets = [0, 7], sizes = [2, 1], strides = [1, 1]} : vector<2x8xf32> to vector<2x1xf32>
    %78 = vector.extract_strided_slice %32 {offsets = [7, 0], sizes = [1, 128], strides = [1, 1]} : vector<8x128xf32> to vector<1x128xf32>
    %79 = vector.broadcast %77 : vector<2x1xf32> to vector<2x128xf32>
    %80 = vector.broadcast %78 : vector<1x128xf32> to vector<2x128xf32>
    %81 = arith.mulf %79, %80 : vector<2x128xf32>
    %82 = arith.addf %76, %81 : vector<2x128xf32>
    %c0_9 = arith.constant 0 : index
    %c0_10 = arith.constant 0 : index
    %83 = vector.load %arg5[%c0_9, %c0_10] : memref<2x128xf32, #tpu.memory_space<vmem>>, vector<2x128xf32>
    tpu.vector_store %arg5[%c0_9, %c0_10], %82 {strides = array<i32>} : memref<2x128xf32, #tpu.memory_space<vmem>>, vector<2x128xf32>,
    return
  }
}

</mosaic_0001>

<bundles_post_ra>
// kernel: tpu_custom_call.1
= control target key start
LH: loop header
LB: loop body
LE: loop exit
PB: predicated region body
PF: predicated region fallthrough
CT: control target
= control target key end

     0   :  { %v219_v1 = vmov 1   ;;  %v220_v2 = vmov 0   ;;  %s285_s0 = inlined_call_operand.vmem [shape: f32[4,128], index: 0, kind: input, shape index: {}]   ;;  %s286_s1 = inlined_call_operand.vmem [shape: f32[8,4], index: 1, kind: input, shape index: {}]   ;;  %s287_s2 = inlined_call_operand.vmem [shape: f32[8,1], index: 2, kind: input, shape index: {}]   ;;  %s288_s3 = inlined_call_operand.vmem [shape: f32[2,8], index: 3, kind: input, shape index: {}]   ;;  %s289_s4 = inlined_call_operand.vmem [shape: f32[2,1], index: 4, kind: input, shape index: {}]   ;;  %s290_s5 = inlined_call_operand.hbm [shape: f32[2,128], index: 5, kind: output, shape index: {}]  }
   0x1   :  { %v22_v0 = vld [vmem:[%s286_s1] sm:$0xff]  ;;  %184 = vset.pattern.permute.xlu1 %v219_v1  ;;  %183 = vset.pattern.permute.xlu0 %v220_v2 }
   0x2   :  { %43 = vperm.xlu1 %184, %v22_v0   ;;  %33 = vperm.xlu0 %183, %v22_v0  }
   0x3   :  { %10 = vsyncpa [#allocation3], 0  ;;  %v23_v3 = vld [vmem:[%s287_s2] sm:$0xff]  ;;  %v221_v4 = vmov 2   ;;  %v222_v6 = vmov 3   ;;  %v223_v8 = vmov 4   ;;  %v36_v12 = vlaneseq }
   0x4   :  { %v24_v5 = vld [vmem:[%s288_s3] sm:$0x3]  ;;  %v224_v9 = vmov 7   ;;  %v225_v10 = vmov 5   ;;  %v226_v11 = vmov 6  }
   0x5   :  { %v25_v7 = vld [vmem:[%s289_s4] sm:$0x3]  ;;  %v37_v13 = vshrl.u32 %v36_v12, 7 }
   0x6   :  { %185 = vset.pattern.permute.xlu1 %v221_v4  ;;  %28 = vperm.xlu0 %183, %v23_v3   ;;  %v21_v15 = vld [vmem:[%s285_s0] sm:$0xf]  ;;  %s227_s0 = smov [#allocation2]  }
   0x7   :  { %53 = vperm.xlu1 %185, %v22_v0   ;;  %v38_v14 = vsub.s32 0, %v37_v13  ;;  %v48_v16 = vsub.s32 1, %v37_v13  ;;  %v58_v18 = vsub.s32 2, %v37_v13  ;;  %v68_v24 = vsub.s32 3, %v37_v13  ;;  %s166_s4 = sshll.u32 %s227_s0, 4  ;;  %s167_s4 = int_to_ptr.vmem [resolvable:$true] %s166_s4 }
   0x8   :  { %v125_v49 = vsub.s32 4, %v37_v13  ;;  %v135_v54 = vsub.s32 5, %v37_v13  ;;  %v145_v61 = vsub.s32 6, %v37_v13  ;;  %v155_v62 = vsub.s32 7, %v37_v13  ;;  %s195_s25 = scalar_lea.vmem %s167_s4, 32  ;;  %p200_p1 = scmp.lt.s32.totalorder %s167_s4, %s167_s4 }
   0x9   :  { %v39_v17 = vrot.slane %v21_v15, %v38_v14  ;;  %v49_v21 = vrot.slane %v21_v15, %v48_v16  ;;  %v59_v23 = vrot.slane %v21_v15, %v58_v18  ;;  %v69_v30 = vrot.slane %v21_v15, %v68_v24  ;;  %p196_p0 = scmp.ne.s32.totalorder %s167_s4, %s195_s25  ;;  %p201_p2 = scmp.lt.s32.totalorder %s195_s25, %s195_s25 }
   0xa   :  { %186 = vset.pattern.permute.xlu0 %v222_v6 }
   0xb   :  { %187 = vset.pattern.permute.xlu1 %v220_v2  ;;  %63 = vperm.xlu0 %186, %v22_v0   ;;  %p202_p3 = por %p201_p2, %p200_p1 }
   0xc   :  { %80 = vperm.xlu1 %187, %v24_v5  }
   0xd   :  { %p203_p4 = pnand %p202_p3, %p196_p0 }
   0xf   :  { %188 = vset.pattern.permute.xlu0 %v219_v1 }
  0x10   :  { %75 = vperm.xlu1 %187, %v25_v7   ;;  %90 = vperm.xlu0 %188, %v24_v5  }
  0x14   :  { %189 = vset.pattern.permute.xlu1 %v221_v4  ;;  %191 = vset.pattern.permute.xlu0 %v223_v8 }
  0x15   :  { %100 = vperm.xlu1 %189, %v24_v5   ;;  %120 = vperm.xlu0 %191, %v24_v5  }
  0x19   :  { %190 = vset.pattern.permute.xlu1 %v222_v6  ;;  %194 = vset.pattern.permute.xlu0 %v224_v9 }
  0x1a   :  { %110 = vperm.xlu1 %190, %v24_v5   ;;  %150 = vperm.xlu0 %194, %v24_v5  }
  0x1e   :  { %192 = vset.pattern.permute.xlu1 %v225_v10 }
  0x1f   :  { %130 = vperm.xlu1 %192, %v24_v5  }
  0x23   :  { %193 = vset.pattern.permute.xlu1 %v226_v11 }
  0x24   :  { %140 = vperm.xlu1 %193, %v24_v5  }
  0x81   :  { %v44_v19 = vpop.permute.xlu1 %43  ;;  %v34_v20 = vpop.permute.xlu0 %33 }
  0x82   :  { %v40_v22 = vmul.f32 %v39_v17, %v34_v20  ;;  %v50_v26 = vmul.f32 %v49_v21, %v44_v19 }
  0x85   :  { %v29_v25 = vpop.permute.xlu0 %28 }
  0x86   :  { %v41_v27 = vadd.f32 %v40_v22, %v29_v25  ;;  %v54_v28 = vpop.permute.xlu1 %53 }
  0x87   :  { %v60_v29 = vmul.f32 %v59_v23, %v54_v28 }
  0x88   :  { %v51_v31 = vadd.f32 %v50_v26, %v41_v27 }
  0x8a   :  { %v61_v32 = vadd.f32 %v60_v29, %v51_v31  ;;  %v64_v33 = vpop.permute.xlu0 %63 }
  0x8b   :  { %v70_v34 = vmul.f32 %v69_v30, %v64_v33  ;;  %v81_v35 = vpop.permute.xlu1 %80 }
  0x8d   :  { %v71_v36 = vadd.f32 %v70_v34, %v61_v32 }
  0x8f   :  { %v72_v37 = vmax.f32 %v71_v36, 0.0  ;;  %v76_v38 = vpop.permute.xlu1 %75  ;;  %v91_v42 = vpop.permute.xlu0 %90 }
  0x91   :  { %v86_v39 = vrot.slane %v72_v37, %v38_v14  ;;  %v96_v40 = vrot.slane %v72_v37, %v48_v16  ;;  %v106_v46 = vrot.slane %v72_v37, %v58_v18  ;;  %v116_v50 = vrot.slane %v72_v37, %v68_v24 }
  0x92   :  { %v126_v56 = vrot.slane %v72_v37, %v125_v49  ;;  %v136_v60 = vrot.slane %v72_v37, %v135_v54  ;;  %v146_v1 = vrot.slane %v72_v37, %v145_v61  ;;  %v156_v4 = vrot.slane %v72_v37, %v155_v62 }
  0x93   :  { %v87_v41 = vmul.f32 %v86_v39, %v81_v35  ;;  %v97_v45 = vmul.f32 %v96_v40, %v91_v42 }
  0x94   :  { %v101_v43 = vpop.permute.xlu1 %100  ;;  %v121_v55 = vpop.permute.xlu0 %120 }
  0x95   :  { %v88_v44 = vadd.f32 %v87_v41, %v76_v38  ;;  %v107_v48 = vmul.f32 %v106_v46, %v101_v43  ;;  %v127_v58 = vmul.f32 %v126_v56, %v121_v55 }
  0x97   :  { %v98_v47 = vadd.f32 %v97_v45, %v88_v44 }
  0x99   :  { %v108_v51 = vadd.f32 %v107_v48, %v98_v47  ;;  %v111_v52 = vpop.permute.xlu1 %110  ;;  %v151_v2 = vpop.permute.xlu0 %150 }
  0x9a   :  { %v117_v53 = vmul.f32 %v116_v50, %v111_v52  ;;  %v157_v7 = vmul.f32 %v156_v4, %v151_v2 }
  0x9c   :  { %v118_v57 = vadd.f32 %v117_v53, %v108_v51 }
  0x9e   :  { %v131_v59 = vpop.permute.xlu1 %130  ;;  %v128_v63 = vadd.f32 %v127_v58, %v118_v57 }
  0x9f   :  { %v137_v0 = vmul.f32 %v136_v60, %v131_v59 }
  0xa1   :  { %v138_v5 = vadd.f32 %v137_v0, %v128_v63 }
  0xa3   :  { %v141_v3 = vpop.permute.xlu1 %140 }
  0xa4   :  { %v147_v6 = vmul.f32 %v146_v1, %v141_v3 }
  0xa6   :  { %v148_v8 = vadd.f32 %v147_v6, %v138_v5 }
  0xa8   :  { %v158_v9 = vadd.f32 %v157_v7, %v148_v8 }
  0xaa   :  { %159 = vst [vmem:[#allocation2] sm:$0x3] %v158_v9 }
  0xab   :  { %206 = shalt.err (!%p203_p4)
}
  0xac   :  { %s207_s28 = scalar_lea.hbm %s290_s5, 32 }
  0xad   :  { %p208_p5 = scmp.ne.s32.totalorder %s290_s5, %s207_s28  ;;  %p211_p6 = scmp.lt.u32.totalorder %s207_s28, %s290_s5 }
  0xaf   :  { %p213_p7 = pnand %p211_p6, %p208_p5 }
  0xb1   :  { %216 = shalt.err (!%p213_p7)
}
  0xb2   :  { %169 = dma.vmem_to_hbm [thread:$0]  %s167_s4, 32, %s290_s5, [#allocation3]  }
  0xb3   :  { %217 = dma.done.wait [#allocation3], 32  }
  0xb4   :  { %218 = vsyncadd [#allocation3], 4294967264 }
  0xb5   :  { %173 = vsyncpa [#allocation3], 1 }

</bundles_post_ra>
